<compile_context>
chip_gen: v5e
topology: v5e:2x2
jax: 0.10.0
libtpu: 0.0.40
codegen_flags: <defaults>
</compile_context>

<pallas_src>
import jax
import jax.numpy as jnp
from jax.experimental import pallas as pl
from jax.experimental.pallas import tpu as pltpu


_SMALL_BYTES_THRESHOLD = 256 * 1024       # below this, let XLA handle it
_MIN_STEPS_BYTES = 4 * 1024 * 1024        # above this, insist on >= ~8 grid steps


def _scale_kernel(a_ref, x_ref, o_ref):
    # a_ref: (1,) f32 scalar parameter in SMEM (scalar-prefetch arg)
    # x_ref: (tm, tn) input tile in VMEM
    # o_ref: (tm, tn) output tile in VMEM (dtype = promoted output dtype)
    a = a_ref[0]  # single SMEM read per tile
    o_ref[...] = (a * x_ref[...].astype(jnp.float32)).astype(o_ref.dtype)


def _cdiv(a, b):
    return -(-a // b)


def _round_up(v, m):
    return _cdiv(v, m) * m


def _choose_lane_width(total):
    """Largest lane-dense width (multiple of 128) that divides `total`."""
    for w in (1024, 512, 256, 128):
        if total % w == 0:
            return w
    return None


def _hw_caps():
    """(per-tile in+out byte cap, vmem_limit_bytes) per TPU generation."""
    try:
        info = pltpu.get_tpu_info()
        vmem_cap = int(getattr(info, "vmem_capacity_bytes", 64 * 1024 * 1024))
    except Exception:
        vmem_cap = 64 * 1024 * 1024        # conservative (v7x per-core)
    if vmem_cap >= 100 * 1024 * 1024:      # v5e / v6e: 128 MiB VMEM
        return 24 * 1024 * 1024, 96 * 1024 * 1024
    else:                                  # v7x: 64 MiB / TensorCore
        return 12 * 1024 * 1024, 56 * 1024 * 1024


def my_model_forward(a, x, *, tile_bytes_cap=None, min_bytes_for_kernel=_SMALL_BYTES_THRESHOLD):
    """Forward pass of MyModel: A * x (A is a (1,) learnable scalar)."""
    x = jnp.asarray(x)
    a_f32 = jnp.asarray(a, dtype=jnp.float32).reshape(-1)[:1]          # (1,)
    out_dtype = jnp.result_type(jnp.float32, x.dtype)                  # torch promotion
    orig_shape = x.shape

    total = int(x.size)
    if total == 0:
        return jnp.zeros(orig_shape, out_dtype)

    itemsize = jnp.dtype(x.dtype).itemsize
    out_itemsize = jnp.dtype(out_dtype).itemsize
    total_bytes = total * itemsize

    # Tiny/small workloads: pallas_call launch + pipeline prologue dominate.
    if total_bytes < min_bytes_for_kernel:
        return (a_f32[0] * x.astype(jnp.float32)).astype(out_dtype)

    default_tile_cap, vmem_limit_cap = _hw_caps()
    if tile_bytes_cap is None:
        tile_bytes_cap = default_tile_cap

    # --- Re-tile to a lane-dense slab (elementwise => layout is free) -------
    width = _choose_lane_width(total)
    if width is not None:
        x2 = x.reshape(total // width, width)
    elif x.ndim >= 2:
        x2 = x.reshape(-1, x.shape[-1])        # fallback: masked stores, still correct
    else:
        x2 = x.reshape(1, total)
    M, N = x2.shape

    sublane = max(8, 32 // itemsize)           # 8 f32 / 16 bf16 / 32 int8
    combined = itemsize + out_itemsize         # in + out bytes per element

    # --- Column tiling: split N only when a sublane-high full row blows cap --
    if N * combined * sublane <= tile_bytes_cap or N <= 128:
        tn = N
    else:
        tn = max(128, (tile_bytes_cap // (sublane * combined)) // 128 * 128)
        tn = min(tn, N)
    gn = _cdiv(N, tn)

    # --- Row tiling: respect the tile cap, sublane packing, and a minimum ---
    # grid size so v7x's two TensorCores + double-buffering engage.
    cap_rows = max(sublane, (tile_bytes_cap // max(tn * combined, 1)) // sublane * sublane)
    min_steps = 8 if total_bytes > _MIN_STEPS_BYTES else 1
    target_gm = max(1, _cdiv(min_steps, gn))
    tm = min(cap_rows,
             _round_up(_cdiv(M, target_gm), sublane),
             _round_up(M, sublane))
    if tm >= M:
        tm = M                                  # full-dim block (divisibility exempt)
    gm = _cdiv(M, tm)

    tile_bytes = tm * tn * combined
    vmem_limit = int(min(vmem_limit_cap,
                         max(2 * tile_bytes + (4 << 20), 16 << 20)))

    out2 = pl.pallas_call(
        _scale_kernel,
        out_shape=jax.ShapeDtypeStruct((M, N), out_dtype),
        grid_spec=pltpu.PrefetchScalarGridSpec(
            num_scalar_prefetch=1,
            grid=(gm, gn),
            in_specs=[pl.BlockSpec((tm, tn), lambda i, j, a_sc: (i, j))],
            out_specs=pl.BlockSpec((tm, tn), lambda i, j, a_sc: (i, j)),
        ),
        compiler_params=pltpu.CompilerParams(
            dimension_semantics=("parallel", "parallel"),
            vmem_limit_bytes=vmem_limit,
        ),
    )(a_f32, x2)
    return out2.reshape(orig_shape)


if __name__ == "__main__":
    key = jax.random.PRNGKey(0)
    k1, k2, k3 = jax.random.split(key, 3)

    # Parameter: torch.nn.Parameter(torch.zeros(1)) -> shape (1,), init to 0.
    A0 = jnp.zeros((1,), dtype=jnp.float32)
    A1 = jnp.array([2.5], dtype=jnp.float32)

    # 1) The literal spec input torch.Tensor([[1]]) -> tiny, XLA fallback path.
    x_tiny = jnp.array([[1.0]], dtype=jnp.float32)
    out = jax.block_until_ready(my_model_forward(A0, x_tiny))
    assert out.shape == (1, 1) and jnp.allclose(out, 0.0), "mismatch (tiny, A=0)"
    out = jax.block_until_ready(my_model_forward(A1, x_tiny))
    assert jnp.allclose(out, 2.5), "mismatch (tiny, A=2.5)"

    # 2) Kernel path: lane-dense re-tiled slab, single block.
    x = jax.random.normal(k1, (256, 512), dtype=jnp.float32)
    out = jax.block_until_ready(my_model_forward(A1, x, min_bytes_for_kernel=0))
    assert out.shape == x.shape and out.dtype == jnp.float32
    assert jnp.allclose(out, 2.5 * x, rtol=1e-6, atol=1e-6), "mismatch (single block)"
    out0 = jax.block_until_ready(my_model_forward(A0, x, min_bytes_for_kernel=0))
    assert jnp.allclose(out0, 0.0 * x), "mismatch (A=0)"

    # 3) Multi-block grid (small per-tile cap forces gm > 1).
    out = jax.block_until_ready(
        my_model_forward(A1, x, tile_bytes_cap=64 * 1024, min_bytes_for_kernel=0))
    assert jnp.allclose(out, 2.5 * x, rtol=1e-6, atol=1e-6), "mismatch (multi-block)"

    # 4) Odd (non-128-multiple) last dim -> re-tiled to a 512-lane slab.
    xr = jax.random.normal(k2, (100, 384), dtype=jnp.float32)
    out = jax.block_until_ready(my_model_forward(A1, xr, min_bytes_for_kernel=0))
    assert jnp.allclose(out, 2.5 * xr, rtol=1e-6, atol=1e-6), "mismatch (odd last dim)"

    # 5) Total not a multiple of 128 -> masked fallback tiling (full-dim blocks).
    xo = jax.random.normal(k3, (7, 99), dtype=jnp.float32)
    out = jax.block_until_ready(my_model_forward(A1, xo, min_bytes_for_kernel=0))
    assert jnp.allclose(out, 2.5 * xo, rtol=1e-6, atol=1e-6), "mismatch (masked fallback)"

    # 6) bf16 input -> f32 output (PyTorch type-promotion semantics).
    xb = jax.random.normal(k1, (64, 192), dtype=jnp.bfloat16)
    out = jax.block_until_ready(my_model_forward(A1, xb, min_bytes_for_kernel=0))
    assert out.dtype == jnp.float32
    assert jnp.allclose(out, 2.5 * xb.astype(jnp.float32), rtol=1e-3, atol=1e-3), "mismatch (bf16)"

    print("KERNEL_OK")
</pallas_src>

<mosaic_0001>
module attributes {stable_mosaic.version = 11 : i64} {
  func.func @_scale_kernel(%arg0: i32, %arg1: i32, %arg2: memref<1xf32, #tpu.memory_space<smem>>, %arg3: memref<128x1024xf32, #tpu.memory_space<vmem>>, %arg4: memref<128x1024xf32, #tpu.memory_space<vmem>>) attributes {dimension_semantics = [#tpu.dimension_semantics<parallel>, #tpu.dimension_semantics<parallel>], iteration_bounds = array<i64: 1, 1>, scalar_prefetch = 1 : i64, scratch_operands = 0 : i64, tpu.core_type = #tpu.core_type<tc>, window_params = [{transform_indices = @transform_0, window_bounds = array<i64: 128, 1024>}, {transform_indices = @transform_1, window_bounds = array<i64: 128, 1024>}]} {
    %c0 = arith.constant 0 : index
    %0 = memref.load %arg2[%c0] : memref<1xf32, #tpu.memory_space<smem>>
    %c0_0 = arith.constant 0 : index
    %c0_1 = arith.constant 0 : index
    %1 = vector.load %arg3[%c0_0, %c0_1] : memref<128x1024xf32, #tpu.memory_space<vmem>>, vector<128x1024xf32>
    %2 = vector.broadcast %0 : f32 to vector<128x1024xf32>
    %3 = arith.mulf %2, %1 : vector<128x1024xf32>
    %c0_2 = arith.constant 0 : index
    %c0_3 = arith.constant 0 : index
    %4 = vector.load %arg4[%c0_2, %c0_3] : memref<128x1024xf32, #tpu.memory_space<vmem>>, vector<128x1024xf32>
    tpu.vector_store %arg4[%c0_2, %c0_3], %3 {strides = array<i32>} : memref<128x1024xf32, #tpu.memory_space<vmem>>, vector<128x1024xf32>,
    return
  }
  func.func @transform_0(%arg0: i32, %arg1: i32, %arg2: memref<1xf32, #tpu.memory_space<smem>>) -> (i32, i32) {
    %c0_i32 = arith.constant 0 : i32
    return %arg0, %arg1 : i32, i32
  }
  func.func @transform_1(%arg0: i32, %arg1: i32, %arg2: memref<1xf32, #tpu.memory_space<smem>>) -> (i32, i32) {
    %c0_i32 = arith.constant 0 : i32
    return %arg0, %arg1 : i32, i32
  }
}

</mosaic_0001>

<bundles_post_ra>
// kernel: tpu_custom_call.1
= control target key start
LH: loop header
LB: loop body
LE: loop exit
PB: predicated region body
PF: predicated region fallthrough
CT: control target
= control target key end

     0   :  { %8 = vsyncpa [#allocation5], 0  ;;  %s652_s0 = inlined_call_operand.<no memory space> [shape: f32[1], index: 0, kind: input, shape index: {}]   ;;  %s653_s1 = inlined_call_operand.hbm [shape: f32[128,1024], index: 1, kind: input, shape index: {}]   ;;  %s654_s2 = inlined_call_operand.hbm [shape: f32[128,1024], index: 2, kind: output, shape index: {}]  }
   0x1   :  { %9 = vsyncpa [#allocation6], 0  ;;  %s14_s11 = sshll.u32 %s653_s1, 4  ;;  %s488_s12 = smov [#allocation4]   ;;  %s15_s11 = int_to_ptr.hbm [resolvable:$true] %s14_s11 }
   0x2   :  { %s16_s13 = sshll.u32 %s488_s12, 4  ;;  %s489_s14 = smov 1024   ;;  %s17_s13 = int_to_ptr.vmem [resolvable:$true] %s16_s13 }
   0x3   :  { %s490_s15 = smov 64  }
   0x4   :  { %22 = dma.hbm_to_vmem [thread:$0]  %s15_s11, 16384, %s17_s13, [#allocation5], %s489_s14, %s489_s14, %s490_s15  }
   0x5   :  { %484 = dma.done.wait [#allocation5], 16384  }
   0x6   :  { %485 = vsyncadd [#allocation5], 4294950912  ;;  %v516_v0 = vstv %s652_s0  ;;  %v28_v1 = vld [vmem:[#allocation4] sm:$0xff]  ;;  %v29_v2 = vld [vmem:[#allocation4 + $0x8] sm:$0xff]  ;;  %s491_s0 = smov [#allocation7]   ;;  %s419_s20 = sshll.u32 %s654_s2, 4  ;;  %s420_s20 = int_to_ptr.hbm [resolvable:$true] %s419_s20 }
   0x7   :  { %v30_v3 = vld [vmem:[#allocation4 + $0x10] sm:$0xff]  ;;  %v157_v4 = vmul.f32 %v516_v0, %v28_v1  ;;  %v158_v5 = vmul.f32 %v516_v0, %v29_v2  ;;  %v31_v7 = vld [vmem:[#allocation4 + $0x18] sm:$0xff]  ;;  %v32_v8 = vld [vmem:[#allocation4 + $0x20] sm:$0xff]  ;;  %s417_s1 = sshll.u32 %s491_s0, 4  ;;  %s418_s1 = int_to_ptr.vmem [resolvable:$true] %s417_s1 }
   0x8   :  { %v159_v6 = vmul.f32 %v516_v0, %v30_v3  ;;  %v33_v9 = vld [vmem:[#allocation4 + $0x28] sm:$0xff]  ;;  %v160_v10 = vmul.f32 %v516_v0, %v31_v7  ;;  %v34_v11 = vld [vmem:[#allocation4 + $0x30] sm:$0xff]  ;;  %v161_v12 = vmul.f32 %v516_v0, %v32_v8  ;;  %v35_v13 = vld [vmem:[#allocation4 + $0x38] sm:$0xff] }
   0x9   :  { %285 = vst [vmem:[#allocation7] sm:$0xff] %v157_v4  ;;  %v162_v14 = vmul.f32 %v516_v0, %v33_v9  ;;  %v36_v15 = vld [vmem:[#allocation4 + $0x40] sm:$0xff]  ;;  %v163_v16 = vmul.f32 %v516_v0, %v34_v11  ;;  %v37_v17 = vld [vmem:[#allocation4 + $0x48] sm:$0xff]  ;;  %v164_v18 = vmul.f32 %v516_v0, %v35_v13  ;;  %v38_v19 = vld [vmem:[#allocation4 + $0x50] sm:$0xff] }
   0xa   :  { %286 = vst [vmem:[#allocation7 + $0x8] sm:$0xff] %v158_v5  ;;  %v165_v20 = vmul.f32 %v516_v0, %v36_v15  ;;  %v39_v21 = vld [vmem:[#allocation4 + $0x58] sm:$0xff]  ;;  %v166_v22 = vmul.f32 %v516_v0, %v37_v17  ;;  %v40_v23 = vld [vmem:[#allocation4 + $0x60] sm:$0xff]  ;;  %v167_v24 = vmul.f32 %v516_v0, %v38_v19  ;;  %v41_v25 = vld [vmem:[#allocation4 + $0x68] sm:$0xff] }
   0xb   :  { %287 = vst [vmem:[#allocation7 + $0x10] sm:$0xff] %v159_v6  ;;  %v168_v26 = vmul.f32 %v516_v0, %v39_v21  ;;  %v42_v27 = vld [vmem:[#allocation4 + $0x70] sm:$0xff]  ;;  %v169_v28 = vmul.f32 %v516_v0, %v40_v23  ;;  %v43_v29 = vld [vmem:[#allocation4 + $0x78] sm:$0xff]  ;;  %v170_v30 = vmul.f32 %v516_v0, %v41_v25  ;;  %v44_v31 = vld [vmem:[#allocation4 + $0x80] sm:$0xff] }
   0xc   :  { %288 = vst [vmem:[#allocation7 + $0x18] sm:$0xff] %v160_v10  ;;  %v171_v32 = vmul.f32 %v516_v0, %v42_v27  ;;  %v45_v33 = vld [vmem:[#allocation4 + $0x88] sm:$0xff]  ;;  %v172_v34 = vmul.f32 %v516_v0, %v43_v29  ;;  %v46_v35 = vld [vmem:[#allocation4 + $0x90] sm:$0xff]  ;;  %v173_v36 = vmul.f32 %v516_v0, %v44_v31  ;;  %v47_v37 = vld [vmem:[#allocation4 + $0x98] sm:$0xff] }
   0xd   :  { %289 = vst [vmem:[#allocation7 + $0x20] sm:$0xff] %v161_v12  ;;  %v174_v38 = vmul.f32 %v516_v0, %v45_v33  ;;  %v48_v39 = vld [vmem:[#allocation4 + $0xa0] sm:$0xff]  ;;  %v175_v40 = vmul.f32 %v516_v0, %v46_v35  ;;  %v49_v41 = vld [vmem:[#allocation4 + $0xa8] sm:$0xff]  ;;  %v176_v42 = vmul.f32 %v516_v0, %v47_v37  ;;  %v50_v43 = vld [vmem:[#allocation4 + $0xb0] sm:$0xff] }
   0xe   :  { %290 = vst [vmem:[#allocation7 + $0x28] sm:$0xff] %v162_v14  ;;  %v177_v44 = vmul.f32 %v516_v0, %v48_v39  ;;  %v51_v45 = vld [vmem:[#allocation4 + $0xb8] sm:$0xff]  ;;  %v178_v46 = vmul.f32 %v516_v0, %v49_v41  ;;  %v52_v47 = vld [vmem:[#allocation4 + $0xc0] sm:$0xff]  ;;  %v179_v48 = vmul.f32 %v516_v0, %v50_v43  ;;  %v53_v49 = vld [vmem:[#allocation4 + $0xc8] sm:$0xff] }
   0xf   :  { %291 = vst [vmem:[#allocation7 + $0x30] sm:$0xff] %v163_v16  ;;  %v180_v50 = vmul.f32 %v516_v0, %v51_v45  ;;  %v54_v51 = vld [vmem:[#allocation4 + $0xd0] sm:$0xff]  ;;  %v181_v52 = vmul.f32 %v516_v0, %v52_v47  ;;  %v55_v53 = vld [vmem:[#allocation4 + $0xd8] sm:$0xff]  ;;  %v182_v54 = vmul.f32 %v516_v0, %v53_v49  ;;  %v56_v55 = vld [vmem:[#allocation4 + $0xe0] sm:$0xff] }
  0x10   :  { %292 = vst [vmem:[#allocation7 + $0x38] sm:$0xff] %v164_v18  ;;  %v183_v56 = vmul.f32 %v516_v0, %v54_v51  ;;  %v57_v57 = vld [vmem:[#allocation4 + $0xe8] sm:$0xff]  ;;  %v184_v58 = vmul.f32 %v516_v0, %v55_v53  ;;  %v58_v59 = vld [vmem:[#allocation4 + $0xf0] sm:$0xff]  ;;  %v185_v60 = vmul.f32 %v516_v0, %v56_v55  ;;  %v59_v61 = vld [vmem:[#allocation4 + $0xf8] sm:$0xff] }
  0x11   :  { %293 = vst [vmem:[#allocation7 + $0x40] sm:$0xff] %v165_v20  ;;  %v186_v62 = vmul.f32 %v516_v0, %v57_v57  ;;  %v60_v63 = vld [vmem:[#allocation4 + $0x100] sm:$0xff]  ;;  %v187_v1 = vmul.f32 %v516_v0, %v58_v59  ;;  %v61_v2 = vld [vmem:[#allocation4 + $0x108] sm:$0xff]  ;;  %v188_v3 = vmul.f32 %v516_v0, %v59_v61  ;;  %v62_v4 = vld [vmem:[#allocation4 + $0x110] sm:$0xff] }
  0x12   :  { %294 = vst [vmem:[#allocation7 + $0x48] sm:$0xff] %v166_v22  ;;  %v189_v5 = vmul.f32 %v516_v0, %v60_v63  ;;  %v63_v6 = vld [vmem:[#allocation4 + $0x118] sm:$0xff]  ;;  %v190_v7 = vmul.f32 %v516_v0, %v61_v2  ;;  %v64_v8 = vld [vmem:[#allocation4 + $0x120] sm:$0xff]  ;;  %v191_v9 = vmul.f32 %v516_v0, %v62_v4  ;;  %v65_v10 = vld [vmem:[#allocation4 + $0x128] sm:$0xff] }
  0x13   :  { %295 = vst [vmem:[#allocation7 + $0x50] sm:$0xff] %v167_v24  ;;  %v192_v11 = vmul.f32 %v516_v0, %v63_v6  ;;  %v66_v12 = vld [vmem:[#allocation4 + $0x130] sm:$0xff]  ;;  %v193_v13 = vmul.f32 %v516_v0, %v64_v8  ;;  %v67_v14 = vld [vmem:[#allocation4 + $0x138] sm:$0xff]  ;;  %v194_v15 = vmul.f32 %v516_v0, %v65_v10  ;;  %v68_v16 = vld [vmem:[#allocation4 + $0x140] sm:$0xff] }
  0x14   :  { %296 = vst [vmem:[#allocation7 + $0x58] sm:$0xff] %v168_v26  ;;  %v195_v17 = vmul.f32 %v516_v0, %v66_v12  ;;  %v69_v18 = vld [vmem:[#allocation4 + $0x148] sm:$0xff]  ;;  %v196_v19 = vmul.f32 %v516_v0, %v67_v14  ;;  %v70_v20 = vld [vmem:[#allocation4 + $0x150] sm:$0xff]  ;;  %v197_v21 = vmul.f32 %v516_v0, %v68_v16  ;;  %v71_v22 = vld [vmem:[#allocation4 + $0x158] sm:$0xff] }
  0x15   :  { %297 = vst [vmem:[#allocation7 + $0x60] sm:$0xff] %v169_v28  ;;  %v198_v23 = vmul.f32 %v516_v0, %v69_v18  ;;  %v72_v24 = vld [vmem:[#allocation4 + $0x160] sm:$0xff]  ;;  %v199_v25 = vmul.f32 %v516_v0, %v70_v20  ;;  %v73_v26 = vld [vmem:[#allocation4 + $0x168] sm:$0xff]  ;;  %v200_v27 = vmul.f32 %v516_v0, %v71_v22  ;;  %v74_v28 = vld [vmem:[#allocation4 + $0x170] sm:$0xff] }
  0x16   :  { %298 = vst [vmem:[#allocation7 + $0x68] sm:$0xff] %v170_v30  ;;  %v201_v29 = vmul.f32 %v516_v0, %v72_v24  ;;  %v75_v30 = vld [vmem:[#allocation4 + $0x178] sm:$0xff]  ;;  %v202_v31 = vmul.f32 %v516_v0, %v73_v26  ;;  %v203_v33 = vmul.f32 %v516_v0, %v74_v28 }
  0x17   :  { %299 = vst [vmem:[#allocation7 + $0x70] sm:$0xff] %v171_v32  ;;  %v76_v32 = vld [vmem:[#allocation4 + $0x180] sm:$0xff]  ;;  %v204_v35 = vmul.f32 %v516_v0, %v75_v30 }
  0x18   :  { %300 = vst [vmem:[#allocation7 + $0x78] sm:$0xff] %v172_v34  ;;  %v77_v34 = vld [vmem:[#allocation4 + $0x188] sm:$0xff]  ;;  %v205_v37 = vmul.f32 %v516_v0, %v76_v32 }
  0x19   :  { %301 = vst [vmem:[#allocation7 + $0x80] sm:$0xff] %v173_v36  ;;  %v78_v36 = vld [vmem:[#allocation4 + $0x190] sm:$0xff]  ;;  %v206_v39 = vmul.f32 %v516_v0, %v77_v34 }
  0x1a   :  { %302 = vst [vmem:[#allocation7 + $0x88] sm:$0xff] %v174_v38  ;;  %v79_v38 = vld [vmem:[#allocation4 + $0x198] sm:$0xff]  ;;  %v207_v41 = vmul.f32 %v516_v0, %v78_v36 }
  0x1b   :  { %303 = vst [vmem:[#allocation7 + $0x90] sm:$0xff] %v175_v40  ;;  %v80_v40 = vld [vmem:[#allocation4 + $0x1a0] sm:$0xff]  ;;  %v208_v43 = vmul.f32 %v516_v0, %v79_v38 }
  0x1c   :  { %304 = vst [vmem:[#allocation7 + $0x98] sm:$0xff] %v176_v42  ;;  %v81_v42 = vld [vmem:[#allocation4 + $0x1a8] sm:$0xff]  ;;  %v209_v45 = vmul.f32 %v516_v0, %v80_v40 }
  0x1d   :  { %305 = vst [vmem:[#allocation7 + $0xa0] sm:$0xff] %v177_v44  ;;  %v82_v44 = vld [vmem:[#allocation4 + $0x1b0] sm:$0xff]  ;;  %v210_v47 = vmul.f32 %v516_v0, %v81_v42 }
  0x1e   :  { %306 = vst [vmem:[#allocation7 + $0xa8] sm:$0xff] %v178_v46  ;;  %v83_v46 = vld [vmem:[#allocation4 + $0x1b8] sm:$0xff]  ;;  %v211_v49 = vmul.f32 %v516_v0, %v82_v44 }
  0x1f   :  { %307 = vst [vmem:[#allocation7 + $0xb0] sm:$0xff] %v179_v48  ;;  %v84_v48 = vld [vmem:[#allocation4 + $0x1c0] sm:$0xff]  ;;  %v212_v51 = vmul.f32 %v516_v0, %v83_v46 }
  0x20   :  { %308 = vst [vmem:[#allocation7 + $0xb8] sm:$0xff] %v180_v50  ;;  %v85_v50 = vld [vmem:[#allocation4 + $0x1c8] sm:$0xff]  ;;  %v213_v53 = vmul.f32 %v516_v0, %v84_v48 }
  0x21   :  { %309 = vst [vmem:[#allocation7 + $0xc0] sm:$0xff] %v181_v52  ;;  %v86_v52 = vld [vmem:[#allocation4 + $0x1d0] sm:$0xff]  ;;  %v214_v55 = vmul.f32 %v516_v0, %v85_v50 }
  0x22   :  { %310 = vst [vmem:[#allocation7 + $0xc8] sm:$0xff] %v182_v54  ;;  %v87_v54 = vld [vmem:[#allocation4 + $0x1d8] sm:$0xff]  ;;  %v215_v57 = vmul.f32 %v516_v0, %v86_v52 }
  0x23   :  { %311 = vst [vmem:[#allocation7 + $0xd0] sm:$0xff] %v183_v56  ;;  %v88_v56 = vld [vmem:[#allocation4 + $0x1e0] sm:$0xff]  ;;  %v216_v59 = vmul.f32 %v516_v0, %v87_v54 }
  0x24   :  { %312 = vst [vmem:[#allocation7 + $0xd8] sm:$0xff] %v184_v58  ;;  %v89_v58 = vld [vmem:[#allocation4 + $0x1e8] sm:$0xff]  ;;  %v217_v61 = vmul.f32 %v516_v0, %v88_v56 }
  0x25   :  { %313 = vst [vmem:[#allocation7 + $0xe0] sm:$0xff] %v185_v60  ;;  %v90_v60 = vld [vmem:[#allocation4 + $0x1f0] sm:$0xff]  ;;  %v218_v63 = vmul.f32 %v516_v0, %v89_v58 }
  0x26   :  { %314 = vst [vmem:[#allocation7 + $0xe8] sm:$0xff] %v186_v62  ;;  %v91_v62 = vld [vmem:[#allocation4 + $0x1f8] sm:$0xff]  ;;  %v219_v2 = vmul.f32 %v516_v0, %v90_v60 }
  0x27   :  { %315 = vst [vmem:[#allocation7 + $0xf0] sm:$0xff] %v187_v1  ;;  %v92_v1 = vld [vmem:[#allocation4 + $0x200] sm:$0xff]  ;;  %v220_v4 = vmul.f32 %v516_v0, %v91_v62 }
  0x28   :  { %316 = vst [vmem:[#allocation7 + $0xf8] sm:$0xff] %v188_v3  ;;  %v93_v3 = vld [vmem:[#allocation4 + $0x208] sm:$0xff]  ;;  %v221_v6 = vmul.f32 %v516_v0, %v92_v1 }
  0x29   :  { %317 = vst [vmem:[#allocation7 + $0x100] sm:$0xff] %v189_v5  ;;  %v94_v5 = vld [vmem:[#allocation4 + $0x210] sm:$0xff]  ;;  %v222_v8 = vmul.f32 %v516_v0, %v93_v3 }
  0x2a   :  { %318 = vst [vmem:[#allocation7 + $0x108] sm:$0xff] %v190_v7  ;;  %v95_v7 = vld [vmem:[#allocation4 + $0x218] sm:$0xff]  ;;  %v223_v10 = vmul.f32 %v516_v0, %v94_v5 }
  0x2b   :  { %319 = vst [vmem:[#allocation7 + $0x110] sm:$0xff] %v191_v9  ;;  %v96_v9 = vld [vmem:[#allocation4 + $0x220] sm:$0xff]  ;;  %v224_v12 = vmul.f32 %v516_v0, %v95_v7 }
  0x2c   :  { %320 = vst [vmem:[#allocation7 + $0x118] sm:$0xff] %v192_v11  ;;  %v97_v11 = vld [vmem:[#allocation4 + $0x228] sm:$0xff]  ;;  %v225_v14 = vmul.f32 %v516_v0, %v96_v9 }
  0x2d   :  { %321 = vst [vmem:[#allocation7 + $0x120] sm:$0xff] %v193_v13  ;;  %v98_v13 = vld [vmem:[#allocation4 + $0x230] sm:$0xff]  ;;  %v226_v16 = vmul.f32 %v516_v0, %v97_v11 }
  0x2e   :  { %322 = vst [vmem:[#allocation7 + $0x128] sm:$0xff] %v194_v15  ;;  %v99_v15 = vld [vmem:[#allocation4 + $0x238] sm:$0xff]  ;;  %v227_v18 = vmul.f32 %v516_v0, %v98_v13 }
  0x2f   :  { %323 = vst [vmem:[#allocation7 + $0x130] sm:$0xff] %v195_v17  ;;  %v100_v17 = vld [vmem:[#allocation4 + $0x240] sm:$0xff]  ;;  %v228_v20 = vmul.f32 %v516_v0, %v99_v15 }
  0x30   :  { %324 = vst [vmem:[#allocation7 + $0x138] sm:$0xff] %v196_v19  ;;  %v101_v19 = vld [vmem:[#allocation4 + $0x248] sm:$0xff]  ;;  %v229_v22 = vmul.f32 %v516_v0, %v100_v17 }
  0x31   :  { %325 = vst [vmem:[#allocation7 + $0x140] sm:$0xff] %v197_v21  ;;  %v102_v21 = vld [vmem:[#allocation4 + $0x250] sm:$0xff]  ;;  %v230_v24 = vmul.f32 %v516_v0, %v101_v19 }
  0x32   :  { %326 = vst [vmem:[#allocation7 + $0x148] sm:$0xff] %v198_v23  ;;  %v103_v23 = vld [vmem:[#allocation4 + $0x258] sm:$0xff]  ;;  %v231_v26 = vmul.f32 %v516_v0, %v102_v21 }
  0x33   :  { %327 = vst [vmem:[#allocation7 + $0x150] sm:$0xff] %v199_v25  ;;  %v104_v25 = vld [vmem:[#allocation4 + $0x260] sm:$0xff]  ;;  %v232_v28 = vmul.f32 %v516_v0, %v103_v23 }
  0x34   :  { %328 = vst [vmem:[#allocation7 + $0x158] sm:$0xff] %v200_v27  ;;  %v105_v27 = vld [vmem:[#allocation4 + $0x268] sm:$0xff]  ;;  %v233_v30 = vmul.f32 %v516_v0, %v104_v25 }
  0x35   :  { %329 = vst [vmem:[#allocation7 + $0x160] sm:$0xff] %v201_v29  ;;  %v106_v29 = vld [vmem:[#allocation4 + $0x270] sm:$0xff]  ;;  %v234_v32 = vmul.f32 %v516_v0, %v105_v27 }
  0x36   :  { %330 = vst [vmem:[#allocation7 + $0x168] sm:$0xff] %v202_v31  ;;  %v107_v31 = vld [vmem:[#allocation4 + $0x278] sm:$0xff]  ;;  %v235_v34 = vmul.f32 %v516_v0, %v106_v29 }
  0x37   :  { %331 = vst [vmem:[#allocation7 + $0x170] sm:$0xff] %v203_v33  ;;  %v108_v33 = vld [vmem:[#allocation4 + $0x280] sm:$0xff]  ;;  %v236_v36 = vmul.f32 %v516_v0, %v107_v31 }
  0x38   :  { %332 = vst [vmem:[#allocation7 + $0x178] sm:$0xff] %v204_v35  ;;  %v109_v35 = vld [vmem:[#allocation4 + $0x288] sm:$0xff]  ;;  %v237_v38 = vmul.f32 %v516_v0, %v108_v33 }
  0x39   :  { %333 = vst [vmem:[#allocation7 + $0x180] sm:$0xff] %v205_v37  ;;  %v110_v37 = vld [vmem:[#allocation4 + $0x290] sm:$0xff]  ;;  %v238_v40 = vmul.f32 %v516_v0, %v109_v35 }
  0x3a   :  { %334 = vst [vmem:[#allocation7 + $0x188] sm:$0xff] %v206_v39  ;;  %v111_v39 = vld [vmem:[#allocation4 + $0x298] sm:$0xff]  ;;  %v239_v42 = vmul.f32 %v516_v0, %v110_v37 }
  0x3b   :  { %335 = vst [vmem:[#allocation7 + $0x190] sm:$0xff] %v207_v41  ;;  %v112_v41 = vld [vmem:[#allocation4 + $0x2a0] sm:$0xff]  ;;  %v240_v44 = vmul.f32 %v516_v0, %v111_v39 }
  0x3c   :  { %336 = vst [vmem:[#allocation7 + $0x198] sm:$0xff] %v208_v43  ;;  %v113_v43 = vld [vmem:[#allocation4 + $0x2a8] sm:$0xff]  ;;  %v241_v46 = vmul.f32 %v516_v0, %v112_v41 }
  0x3d   :  { %337 = vst [vmem:[#allocation7 + $0x1a0] sm:$0xff] %v209_v45  ;;  %v114_v45 = vld [vmem:[#allocation4 + $0x2b0] sm:$0xff]  ;;  %v242_v48 = vmul.f32 %v516_v0, %v113_v43 }
  0x3e   :  { %338 = vst [vmem:[#allocation7 + $0x1a8] sm:$0xff] %v210_v47  ;;  %v115_v47 = vld [vmem:[#allocation4 + $0x2b8] sm:$0xff]  ;;  %v243_v50 = vmul.f32 %v516_v0, %v114_v45 }
  0x3f   :  { %339 = vst [vmem:[#allocation7 + $0x1b0] sm:$0xff] %v211_v49  ;;  %v116_v49 = vld [vmem:[#allocation4 + $0x2c0] sm:$0xff]  ;;  %v244_v52 = vmul.f32 %v516_v0, %v115_v47 }
  0x40   :  { %340 = vst [vmem:[#allocation7 + $0x1b8] sm:$0xff] %v212_v51  ;;  %v117_v51 = vld [vmem:[#allocation4 + $0x2c8] sm:$0xff]  ;;  %v245_v54 = vmul.f32 %v516_v0, %v116_v49 }
  0x41   :  { %341 = vst [vmem:[#allocation7 + $0x1c0] sm:$0xff] %v213_v53  ;;  %v118_v53 = vld [vmem:[#allocation4 + $0x2d0] sm:$0xff]  ;;  %v246_v56 = vmul.f32 %v516_v0, %v117_v51 }
  0x42   :  { %342 = vst [vmem:[#allocation7 + $0x1c8] sm:$0xff] %v214_v55  ;;  %v119_v55 = vld [vmem:[#allocation4 + $0x2d8] sm:$0xff]  ;;  %v247_v58 = vmul.f32 %v516_v0, %v118_v53 }
  0x43   :  { %343 = vst [vmem:[#allocation7 + $0x1d0] sm:$0xff] %v215_v57  ;;  %v120_v57 = vld [vmem:[#allocation4 + $0x2e0] sm:$0xff]  ;;  %v248_v60 = vmul.f32 %v516_v0, %v119_v55 }
  0x44   :  { %344 = vst [vmem:[#allocation7 + $0x1d8] sm:$0xff] %v216_v59  ;;  %v121_v59 = vld [vmem:[#allocation4 + $0x2e8] sm:$0xff]  ;;  %v249_v62 = vmul.f32 %v516_v0, %v120_v57 }
  0x45   :  { %345 = vst [vmem:[#allocation7 + $0x1e0] sm:$0xff] %v217_v61  ;;  %v122_v61 = vld [vmem:[#allocation4 + $0x2f0] sm:$0xff]  ;;  %v250_v1 = vmul.f32 %v516_v0, %v121_v59 }
  0x46   :  { %346 = vst [vmem:[#allocation7 + $0x1e8] sm:$0xff] %v218_v63  ;;  %v123_v63 = vld [vmem:[#allocation4 + $0x2f8] sm:$0xff]  ;;  %v251_v3 = vmul.f32 %v516_v0, %v122_v61 }
  0x47   :  { %347 = vst [vmem:[#allocation7 + $0x1f0] sm:$0xff] %v219_v2  ;;  %v124_v2 = vld [vmem:[#allocation4 + $0x300] sm:$0xff]  ;;  %v252_v5 = vmul.f32 %v516_v0, %v123_v63 }
  0x48   :  { %348 = vst [vmem:[#allocation7 + $0x1f8] sm:$0xff] %v220_v4  ;;  %v125_v4 = vld [vmem:[#allocation4 + $0x308] sm:$0xff]  ;;  %v253_v7 = vmul.f32 %v516_v0, %v124_v2 }
  0x49   :  { %349 = vst [vmem:[#allocation7 + $0x200] sm:$0xff] %v221_v6  ;;  %v126_v6 = vld [vmem:[#allocation4 + $0x310] sm:$0xff]  ;;  %v254_v9 = vmul.f32 %v516_v0, %v125_v4 }
  0x4a   :  { %350 = vst [vmem:[#allocation7 + $0x208] sm:$0xff] %v222_v8  ;;  %v127_v8 = vld [vmem:[#allocation4 + $0x318] sm:$0xff]  ;;  %v255_v11 = vmul.f32 %v516_v0, %v126_v6 }
  0x4b   :  { %351 = vst [vmem:[#allocation7 + $0x210] sm:$0xff] %v223_v10  ;;  %v128_v10 = vld [vmem:[#allocation4 + $0x320] sm:$0xff]  ;;  %v256_v13 = vmul.f32 %v516_v0, %v127_v8 }
  0x4c   :  { %352 = vst [vmem:[#allocation7 + $0x218] sm:$0xff] %v224_v12  ;;  %v129_v12 = vld [vmem:[#allocation4 + $0x328] sm:$0xff]  ;;  %v257_v15 = vmul.f32 %v516_v0, %v128_v10 }
  0x4d   :  { %353 = vst [vmem:[#allocation7 + $0x220] sm:$0xff] %v225_v14  ;;  %v130_v14 = vld [vmem:[#allocation4 + $0x330] sm:$0xff]  ;;  %v258_v17 = vmul.f32 %v516_v0, %v129_v12 }
  0x4e   :  { %354 = vst [vmem:[#allocation7 + $0x228] sm:$0xff] %v226_v16  ;;  %v131_v16 = vld [vmem:[#allocation4 + $0x338] sm:$0xff]  ;;  %v259_v19 = vmul.f32 %v516_v0, %v130_v14 }
  0x4f   :  { %355 = vst [vmem:[#allocation7 + $0x230] sm:$0xff] %v227_v18  ;;  %v132_v18 = vld [vmem:[#allocation4 + $0x340] sm:$0xff]  ;;  %v260_v21 = vmul.f32 %v516_v0, %v131_v16 }
  0x50   :  { %356 = vst [vmem:[#allocation7 + $0x238] sm:$0xff] %v228_v20  ;;  %v133_v20 = vld [vmem:[#allocation4 + $0x348] sm:$0xff]  ;;  %v261_v23 = vmul.f32 %v516_v0, %v132_v18 }
  0x51   :  { %357 = vst [vmem:[#allocation7 + $0x240] sm:$0xff] %v229_v22  ;;  %v134_v22 = vld [vmem:[#allocation4 + $0x350] sm:$0xff]  ;;  %v262_v25 = vmul.f32 %v516_v0, %v133_v20 }
  0x52   :  { %358 = vst [vmem:[#allocation7 + $0x248] sm:$0xff] %v230_v24  ;;  %v135_v24 = vld [vmem:[#allocation4 + $0x358] sm:$0xff]  ;;  %v263_v27 = vmul.f32 %v516_v0, %v134_v22 }
  0x53   :  { %359 = vst [vmem:[#allocation7 + $0x250] sm:$0xff] %v231_v26  ;;  %v136_v26 = vld [vmem:[#allocation4 + $0x360] sm:$0xff]  ;;  %v264_v29 = vmul.f32 %v516_v0, %v135_v24 }
  0x54   :  { %360 = vst [vmem:[#allocation7 + $0x258] sm:$0xff] %v232_v28  ;;  %v137_v28 = vld [vmem:[#allocation4 + $0x368] sm:$0xff]  ;;  %v265_v31 = vmul.f32 %v516_v0, %v136_v26 }
  0x55   :  { %361 = vst [vmem:[#allocation7 + $0x260] sm:$0xff] %v233_v30  ;;  %v138_v30 = vld [vmem:[#allocation4 + $0x370] sm:$0xff]  ;;  %v266_v33 = vmul.f32 %v516_v0, %v137_v28 }
  0x56   :  { %362 = vst [vmem:[#allocation7 + $0x268] sm:$0xff] %v234_v32  ;;  %v139_v32 = vld [vmem:[#allocation4 + $0x378] sm:$0xff]  ;;  %v267_v35 = vmul.f32 %v516_v0, %v138_v30 }
  0x57   :  { %363 = vst [vmem:[#allocation7 + $0x270] sm:$0xff] %v235_v34  ;;  %v140_v34 = vld [vmem:[#allocation4 + $0x380] sm:$0xff]  ;;  %v268_v37 = vmul.f32 %v516_v0, %v139_v32 }
  0x58   :  { %364 = vst [vmem:[#allocation7 + $0x278] sm:$0xff] %v236_v36  ;;  %v141_v36 = vld [vmem:[#allocation4 + $0x388] sm:$0xff]  ;;  %v269_v39 = vmul.f32 %v516_v0, %v140_v34 }
  0x59   :  { %365 = vst [vmem:[#allocation7 + $0x280] sm:$0xff] %v237_v38  ;;  %v142_v38 = vld [vmem:[#allocation4 + $0x390] sm:$0xff]  ;;  %v270_v41 = vmul.f32 %v516_v0, %v141_v36 }
  0x5a   :  { %366 = vst [vmem:[#allocation7 + $0x288] sm:$0xff] %v238_v40  ;;  %v143_v40 = vld [vmem:[#allocation4 + $0x398] sm:$0xff]  ;;  %v271_v43 = vmul.f32 %v516_v0, %v142_v38 }
  0x5b   :  { %367 = vst [vmem:[#allocation7 + $0x290] sm:$0xff] %v239_v42  ;;  %v144_v42 = vld [vmem:[#allocation4 + $0x3a0] sm:$0xff]  ;;  %v272_v45 = vmul.f32 %v516_v0, %v143_v40 }
  0x5c   :  { %368 = vst [vmem:[#allocation7 + $0x298] sm:$0xff] %v240_v44  ;;  %v145_v44 = vld [vmem:[#allocation4 + $0x3a8] sm:$0xff]  ;;  %v273_v47 = vmul.f32 %v516_v0, %v144_v42 }
  0x5d   :  { %369 = vst [vmem:[#allocation7 + $0x2a0] sm:$0xff] %v241_v46  ;;  %v146_v46 = vld [vmem:[#allocation4 + $0x3b0] sm:$0xff]  ;;  %v274_v49 = vmul.f32 %v516_v0, %v145_v44 }
  0x5e   :  { %370 = vst [vmem:[#allocation7 + $0x2a8] sm:$0xff] %v242_v48  ;;  %v147_v48 = vld [vmem:[#allocation4 + $0x3b8] sm:$0xff]  ;;  %v275_v51 = vmul.f32 %v516_v0, %v146_v46 }
  0x5f   :  { %371 = vst [vmem:[#allocation7 + $0x2b0] sm:$0xff] %v243_v50  ;;  %v148_v50 = vld [vmem:[#allocation4 + $0x3c0] sm:$0xff]  ;;  %v276_v53 = vmul.f32 %v516_v0, %v147_v48 }
  0x60   :  { %372 = vst [vmem:[#allocation7 + $0x2b8] sm:$0xff] %v244_v52  ;;  %v149_v52 = vld [vmem:[#allocation4 + $0x3c8] sm:$0xff]  ;;  %v277_v55 = vmul.f32 %v516_v0, %v148_v50 }
  0x61   :  { %373 = vst [vmem:[#allocation7 + $0x2c0] sm:$0xff] %v245_v54  ;;  %v150_v54 = vld [vmem:[#allocation4 + $0x3d0] sm:$0xff]  ;;  %v278_v57 = vmul.f32 %v516_v0, %v149_v52 }
  0x62   :  { %374 = vst [vmem:[#allocation7 + $0x2c8] sm:$0xff] %v246_v56  ;;  %v151_v56 = vld [vmem:[#allocation4 + $0x3d8] sm:$0xff]  ;;  %v279_v59 = vmul.f32 %v516_v0, %v150_v54 }
  0x63   :  { %375 = vst [vmem:[#allocation7 + $0x2d0] sm:$0xff] %v247_v58  ;;  %v152_v58 = vld [vmem:[#allocation4 + $0x3e0] sm:$0xff]  ;;  %v280_v61 = vmul.f32 %v516_v0, %v151_v56 }
  0x64   :  { %376 = vst [vmem:[#allocation7 + $0x2d8] sm:$0xff] %v248_v60  ;;  %v153_v60 = vld [vmem:[#allocation4 + $0x3e8] sm:$0xff]  ;;  %v281_v63 = vmul.f32 %v516_v0, %v152_v58 }
  0x65   :  { %377 = vst [vmem:[#allocation7 + $0x2e0] sm:$0xff] %v249_v62  ;;  %v154_v62 = vld [vmem:[#allocation4 + $0x3f0] sm:$0xff]  ;;  %v282_v2 = vmul.f32 %v516_v0, %v153_v60 }
  0x66   :  { %378 = vst [vmem:[#allocation7 + $0x2e8] sm:$0xff] %v250_v1  ;;  %v155_v1 = vld [vmem:[#allocation4 + $0x3f8] sm:$0xff] }
  0x67   :  { %379 = vst [vmem:[#allocation7 + $0x2f0] sm:$0xff] %v251_v3  ;;  %v283_v3 = vmul.f32 %v516_v0, %v154_v62  ;;  %v284_v4 = vmul.f32 %v516_v0, %v155_v1 }
  0x68   :  { %380 = vst [vmem:[#allocation7 + $0x2f8] sm:$0xff] %v252_v5 }
  0x69   :  { %381 = vst [vmem:[#allocation7 + $0x300] sm:$0xff] %v253_v7 }
  0x6a   :  { %382 = vst [vmem:[#allocation7 + $0x308] sm:$0xff] %v254_v9 }
  0x6b   :  { %383 = vst [vmem:[#allocation7 + $0x310] sm:$0xff] %v255_v11 }
  0x6c   :  { %384 = vst [vmem:[#allocation7 + $0x318] sm:$0xff] %v256_v13 }
  0x6d   :  { %385 = vst [vmem:[#allocation7 + $0x320] sm:$0xff] %v257_v15 }
  0x6e   :  { %386 = vst [vmem:[#allocation7 + $0x328] sm:$0xff] %v258_v17 }
  0x6f   :  { %387 = vst [vmem:[#allocation7 + $0x330] sm:$0xff] %v259_v19 }
  0x70   :  { %388 = vst [vmem:[#allocation7 + $0x338] sm:$0xff] %v260_v21 }
  0x71   :  { %389 = vst [vmem:[#allocation7 + $0x340] sm:$0xff] %v261_v23 }
  0x72   :  { %390 = vst [vmem:[#allocation7 + $0x348] sm:$0xff] %v262_v25 }
  0x73   :  { %391 = vst [vmem:[#allocation7 + $0x350] sm:$0xff] %v263_v27 }
  0x74   :  { %392 = vst [vmem:[#allocation7 + $0x358] sm:$0xff] %v264_v29 }
  0x75   :  { %393 = vst [vmem:[#allocation7 + $0x360] sm:$0xff] %v265_v31 }
  0x76   :  { %394 = vst [vmem:[#allocation7 + $0x368] sm:$0xff] %v266_v33 }
  0x77   :  { %395 = vst [vmem:[#allocation7 + $0x370] sm:$0xff] %v267_v35 }
  0x78   :  { %396 = vst [vmem:[#allocation7 + $0x378] sm:$0xff] %v268_v37 }
  0x79   :  { %397 = vst [vmem:[#allocation7 + $0x380] sm:$0xff] %v269_v39 }
  0x7a   :  { %398 = vst [vmem:[#allocation7 + $0x388] sm:$0xff] %v270_v41 }
  0x7b   :  { %399 = vst [vmem:[#allocation7 + $0x390] sm:$0xff] %v271_v43 }
  0x7c   :  { %400 = vst [vmem:[#allocation7 + $0x398] sm:$0xff] %v272_v45 }
  0x7d   :  { %401 = vst [vmem:[#allocation7 + $0x3a0] sm:$0xff] %v273_v47 }
  0x7e   :  { %402 = vst [vmem:[#allocation7 + $0x3a8] sm:$0xff] %v274_v49 }
  0x7f   :  { %403 = vst [vmem:[#allocation7 + $0x3b0] sm:$0xff] %v275_v51 }
  0x80   :  { %404 = vst [vmem:[#allocation7 + $0x3b8] sm:$0xff] %v276_v53 }
  0x81   :  { %405 = vst [vmem:[#allocation7 + $0x3c0] sm:$0xff] %v277_v55 }
  0x82   :  { %406 = vst [vmem:[#allocation7 + $0x3c8] sm:$0xff] %v278_v57 }
  0x83   :  { %407 = vst [vmem:[#allocation7 + $0x3d0] sm:$0xff] %v279_v59 }
  0x84   :  { %408 = vst [vmem:[#allocation7 + $0x3d8] sm:$0xff] %v280_v61 }
  0x85   :  { %409 = vst [vmem:[#allocation7 + $0x3e0] sm:$0xff] %v281_v63 }
  0x86   :  { %410 = vst [vmem:[#allocation7 + $0x3e8] sm:$0xff] %v282_v2 }
  0x87   :  { %411 = vst [vmem:[#allocation7 + $0x3f0] sm:$0xff] %v283_v3 }
  0x88   :  { %412 = vst [vmem:[#allocation7 + $0x3f8] sm:$0xff] %v284_v4 }
  0x89   :  { %425 = dma.vmem_to_hbm [thread:$0]  %s418_s1, 16384, %s420_s20, [#allocation6], %s489_s14, %s489_s14, %s490_s15  }
  0x8a   :  { %486 = dma.done.wait [#allocation6], 16384  }
  0x8b   :  { %487 = vsyncadd [#allocation6], 4294950912 }
  0x8c   :  { %430 = vsyncpa [#allocation5], 1 }
  0x8d   :  { %431 = vsyncpa [#allocation6], 1 }

</bundles_post_ra>
